<compile_context>
chip_gen: v5e
topology: v5e:2x2
jax: 0.10.0
libtpu: 0.0.40
codegen_flags: <defaults>
</compile_context>

<pallas_src>
import jax
import jax.numpy as jnp
from jax.experimental import pallas as pl
from jax.experimental.pallas import tpu as pltpu


def _round_up(a, b):
    return (a + b - 1) // b * b


def _linear_kernel(x_ref, w_ref, b_ref, o_ref, acc_ref):
    """Computes one (tm, tn) output tile; K is the innermost (reduction) grid axis."""
    k = pl.program_id(2)

    @pl.when(k == 0)
    def _init():
        acc_ref[...] = jnp.zeros_like(acc_ref)

    acc_ref[...] += jnp.dot(
        x_ref[...], w_ref[...], preferred_element_type=jnp.float32
    )

    @pl.when(k == pl.num_programs(2) - 1)
    def _finalize():
        # Bias stays f32 and is added to the f32 accumulator (exact); cast once.
        o_ref[...] = (acc_ref[...] + b_ref[...]).astype(o_ref.dtype)


def custom_linear(x, vector_bank, index, input_dim, output_dim, bias=None,
                  *, tm_max=512, tn_max=512, tk_max=512):
    """Pallas-TPU equivalent of CustomLinear.forward(x, vector_bank)."""
    orig_lead = x.shape[:-1]
    K = x.shape[-1]
    assert K == input_dim
    x2 = x.reshape(-1, K)
    M = x2.shape[0]
    N = output_dim

    # --- weight construction (gather + view): glue, plain JAX ---------------------
    weight = vector_bank[index].reshape(input_dim, output_dim).astype(x.dtype)

    # --- tile sizes / zero-padding to lane-dense, (8,128)-aligned shapes ----------
    tm = min(tm_max, _round_up(M, 8))
    tn = min(tn_max, _round_up(N, 128))   # lane-dense output stores
    tk = min(tk_max, _round_up(K, 128))
    Mp, Np, Kp = _round_up(M, tm), _round_up(N, tn), _round_up(K, tk)

    x_p = jnp.pad(x2, ((0, Mp - M), (0, Kp - K))) if (Mp, Kp) != (M, K) else x2
    w_p = (jnp.pad(weight, ((0, Kp - K), (0, Np - N)))
           if (Kp, Np) != (K, N) else weight)

    if bias is None:
        b_p = jnp.zeros((1, Np), jnp.float32)
    else:
        b_p = jnp.pad(bias.astype(jnp.float32).reshape(1, N),
                      ((0, 0), (0, Np - N)))

    grid = (Mp // tm, Np // tn, Kp // tk)

    flops = 2 * Mp * Np * Kp
    bytes_accessed = (x_p.size * x_p.dtype.itemsize
                      + w_p.size * w_p.dtype.itemsize
                      + b_p.size * 4
                      + Mp * Np * x.dtype.itemsize)

    out_p = pl.pallas_call(
        _linear_kernel,
        out_shape=jax.ShapeDtypeStruct((Mp, Np), x.dtype),
        grid_spec=pltpu.PrefetchScalarGridSpec(
            num_scalar_prefetch=0,
            grid=grid,
            in_specs=[
                pl.BlockSpec((tm, tk), lambda i, j, k: (i, k)),   # x tile
                pl.BlockSpec((tk, tn), lambda i, j, k: (k, j)),   # weight tile
                pl.BlockSpec((1, tn), lambda i, j, k: (0, j)),    # f32 bias slab
            ],
            out_specs=pl.BlockSpec((tm, tn), lambda i, j, k: (i, j)),
            scratch_shapes=[pltpu.VMEM((tm, tn), jnp.float32)],
        ),
        compiler_params=pltpu.CompilerParams(
            dimension_semantics=("parallel", "parallel", "arbitrary")),
        cost_estimate=pl.CostEstimate(
            flops=flops, transcendentals=0, bytes_accessed=bytes_accessed),
    )(x_p, w_p, b_p)

    return out_p[:M, :N].reshape(*orig_lead, N)


if __name__ == "__main__":
    # ---- small test (tiny shapes consistent with the module) ----------------------
    input_dim, output_dim, vector_dim, batch = 32, 32, 8, 8
    assert (input_dim * output_dim) % vector_dim == 0
    index_length = input_dim * output_dim // vector_dim  # 128

    k_x, k_bank, k_idx, k_b = jax.random.split(jax.random.PRNGKey(0), 4)
    x = jax.random.normal(k_x, (batch, input_dim), dtype=jnp.float32)
    vector_bank = jax.random.normal(k_bank, (index_length, vector_dim),
                                    dtype=jnp.float32)
    index = jax.random.randint(k_idx, (index_length,), 0, index_length,
                               dtype=jnp.int32)
    bias = 0.1 * jax.random.normal(k_b, (output_dim,), dtype=jnp.float32)

    out_b = jax.block_until_ready(
        custom_linear(x, vector_bank, index, input_dim, output_dim, bias=bias))
    out_nb = jax.block_until_ready(
        custom_linear(x, vector_bank, index, input_dim, output_dim, bias=None))

    w_ref = vector_bank[index].reshape(input_dim, output_dim)
    ref_b = x @ w_ref + bias
    ref_nb = x @ w_ref

    assert out_b.shape == (batch, output_dim)
    assert jnp.allclose(out_b, ref_b, atol=1e-3, rtol=1e-3)
    assert jnp.allclose(out_nb, ref_nb, atol=1e-3, rtol=1e-3)

    # ---- larger test: exercises K-reduction (2 steps), N tiling, and batch dims ---
    input_dim2, output_dim2, vector_dim2 = 1024, 640, 8
    index_length2 = input_dim2 * output_dim2 // vector_dim2
    k_x2, k_bank2, k_idx2, k_b2 = jax.random.split(jax.random.PRNGKey(1), 4)
    x2 = jax.random.normal(k_x2, (4, 48, input_dim2), dtype=jnp.float32)
    bank2 = jax.random.normal(k_bank2, (index_length2, vector_dim2),
                              dtype=jnp.float32)
    idx2 = jax.random.randint(k_idx2, (index_length2,), 0, index_length2,
                              dtype=jnp.int32)
    bias2 = 0.1 * jax.random.normal(k_b2, (output_dim2,), dtype=jnp.float32)

    out2 = jax.block_until_ready(
        custom_linear(x2, bank2, idx2, input_dim2, output_dim2, bias=bias2))
    w_ref2 = bank2[idx2].reshape(input_dim2, output_dim2)
    ref2 = x2 @ w_ref2 + bias2

    assert out2.shape == (4, 48, output_dim2)
    # Both kernel and reference accumulate in f32; only tiling order differs.
    assert jnp.allclose(out2, ref2, atol=5e-3, rtol=5e-3)

    print("KERNEL_OK")
</pallas_src>

<mosaic_0001>
module attributes {stable_mosaic.version = 11 : i64} {
  func.func @_linear_kernel(%arg0: i32, %arg1: i32, %arg2: i32, %arg3: memref<8x128xf32, #tpu.memory_space<vmem>>, %arg4: memref<128x128xf32, #tpu.memory_space<vmem>>, %arg5: memref<1x128xf32, #tpu.memory_space<vmem>>, %arg6: memref<8x128xf32, #tpu.memory_space<vmem>>, %arg7: memref<8x128xf32, #tpu.memory_space<vmem>>) attributes {dimension_semantics = [#tpu.dimension_semantics<parallel>, #tpu.dimension_semantics<parallel>, #tpu.dimension_semantics<arbitrary>], iteration_bounds = array<i64: 1, 1, 1>, scalar_prefetch = 0 : i64, scratch_operands = 1 : i64, tpu.core_type = #tpu.core_type<tc>, window_params = [{transform_indices = @transform_0, window_bounds = array<i64: 8, 128>}, {transform_indices = @transform_1, window_bounds = array<i64: 128, 128>}, {transform_indices = @transform_2, window_bounds = array<i64: 1, 128>}, {transform_indices = @transform_3, window_bounds = array<i64: 8, 128>}]} {
    %c0_i32 = arith.constant 0 : i32
    %0 = arith.cmpi eq, %arg2, %c0_i32 : i32
    %1 = arith.extui %0 : i1 to i32
    %c0_i32_0 = arith.constant 0 : i32
    %2 = arith.cmpi ne, %1, %c0_i32_0 : i32
    scf.if %2 {
      %cst_10 = arith.constant 0.000000e+00 : f32
      %12 = vector.broadcast %cst_10 : f32 to vector<8x128xf32>
      %c0_11 = arith.constant 0 : index
      %c0_12 = arith.constant 0 : index
      %13 = vector.load %arg7[%c0_11, %c0_12] : memref<8x128xf32, #tpu.memory_space<vmem>>, vector<8x128xf32>
      tpu.vector_store %arg7[%c0_11, %c0_12], %12 {strides = array<i32>} : memref<8x128xf32, #tpu.memory_space<vmem>>, vector<8x128xf32>,
    } else {
    }
    %c0 = arith.constant 0 : index
    %c0_1 = arith.constant 0 : index
    %3 = vector.load %arg7[%c0, %c0_1] : memref<8x128xf32, #tpu.memory_space<vmem>>, vector<8x128xf32>
    %c0_2 = arith.constant 0 : index
    %c0_3 = arith.constant 0 : index
    %4 = vector.load %arg3[%c0_2, %c0_3] : memref<8x128xf32, #tpu.memory_space<vmem>>, vector<8x128xf32>
    %c0_4 = arith.constant 0 : index
    %c0_5 = arith.constant 0 : index
    %5 = vector.load %arg4[%c0_4, %c0_5] : memref<128x128xf32, #tpu.memory_space<vmem>>, vector<128x128xf32>
    %cst = arith.constant dense<0.000000e+00> : vector<8x128xf32>
    %6 = tpu.matmul %4, %5, %cst {dimension_numbers = #tpu.dot_dimension_numbers<[1], [0], [0], [1], [0, 0, 1, 1], [], []>} : vector<8x128xf32>, vector<128x128xf32>, vector<8x128xf32> -> vector<8x128xf32>
    %7 = arith.addf %3, %6 : vector<8x128xf32>
    %c0_6 = arith.constant 0 : index
    %c0_7 = arith.constant 0 : index
    %8 = vector.load %arg7[%c0_6, %c0_7] : memref<8x128xf32, #tpu.memory_space<vmem>>, vector<8x128xf32>
    tpu.vector_store %arg7[%c0_6, %c0_7], %7 {strides = array<i32>} : memref<8x128xf32, #tpu.memory_space<vmem>>, vector<8x128xf32>,
    %c0_i32_8 = arith.constant 0 : i32
    %9 = arith.cmpi eq, %arg2, %c0_i32_8 : i32
    %10 = arith.extui %9 : i1 to i32
    %c0_i32_9 = arith.constant 0 : i32
    %11 = arith.cmpi ne, %10, %c0_i32_9 : i32
    scf.if %11 {
      %c0_10 = arith.constant 0 : index
      %c0_11 = arith.constant 0 : index
      %12 = vector.load %arg7[%c0_10, %c0_11] : memref<8x128xf32, #tpu.memory_space<vmem>>, vector<8x128xf32>
      %c0_12 = arith.constant 0 : index
      %c0_13 = arith.constant 0 : index
      %13 = vector.load %arg5[%c0_12, %c0_13] : memref<1x128xf32, #tpu.memory_space<vmem>>, vector<1x128xf32>
      %14 = vector.broadcast %13 : vector<1x128xf32> to vector<8x128xf32>
      %15 = arith.addf %12, %14 : vector<8x128xf32>
      %c0_14 = arith.constant 0 : index
      %c0_15 = arith.constant 0 : index
      %16 = vector.load %arg6[%c0_14, %c0_15] : memref<8x128xf32, #tpu.memory_space<vmem>>, vector<8x128xf32>
      tpu.vector_store %arg6[%c0_14, %c0_15], %15 {strides = array<i32>} : memref<8x128xf32, #tpu.memory_space<vmem>>, vector<8x128xf32>,
    } else {
    }
    return
  }
  func.func @transform_0(%arg0: i32, %arg1: i32, %arg2: i32) -> (i32, i32) {
    %c0_i32 = arith.constant 0 : i32
    return %arg0, %arg2 : i32, i32
  }
  func.func @transform_1(%arg0: i32, %arg1: i32, %arg2: i32) -> (i32, i32) {
    %c0_i32 = arith.constant 0 : i32
    return %arg2, %arg1 : i32, i32
  }
  func.func @transform_2(%arg0: i32, %arg1: i32, %arg2: i32) -> (i32, i32) {
    %c0_i32 = arith.constant 0 : i32
    %c0_i32_0 = arith.constant 0 : i32
    return %c0_i32, %arg1 : i32, i32
  }
  func.func @transform_3(%arg0: i32, %arg1: i32, %arg2: i32) -> (i32, i32) {
    %c0_i32 = arith.constant 0 : i32
    return %arg0, %arg1 : i32, i32
  }
}

</mosaic_0001>

<bundles_post_ra>
// kernel: tpu_custom_call.1
= control target key start
LH: loop header
LB: loop body
LE: loop exit
PB: predicated region body
PF: predicated region fallthrough
CT: control target
= control target key end

     0   :  { %8 = vsyncpa [#allocation4], 0  ;;  %s239_s0 = inlined_call_operand.hbm [shape: f32[8,128], index: 0, kind: input, shape index: {}]   ;;  %s240_s1 = inlined_call_operand.hbm [shape: f32[128,128], index: 1, kind: input, shape index: {}]   ;;  %s241_s2 = inlined_call_operand.vmem [shape: f32[1,128], index: 2, kind: input, shape index: {}]   ;;  %s242_s3 = inlined_call_operand.hbm [shape: f32[8,128], index: 3, kind: output, shape index: {}]  }
   0x1   :  { %9 = vsyncpa [#allocation7], 0 }
   0x2   :  { %10 = vsyncpa [#allocation5], 0  ;;  %s16_s14 = sshll.u32 %s239_s0, 4  ;;  %s202_s15 = smov [#allocation3]   ;;  %s17_s14 = int_to_ptr.hbm [resolvable:$true] %s16_s14 }
   0x3   :  { %s18_s16 = sshll.u32 %s202_s15, 4  ;;  %s26_s19 = sshll.u32 %s240_s1, 4  ;;  %s19_s16 = int_to_ptr.vmem [resolvable:$true] %s18_s16  ;;  %s27_s19 = int_to_ptr.hbm [resolvable:$true] %s26_s19 }
   0x4   :  { %21 = dma.hbm_to_vmem [thread:$0]  %s17_s14, 128, %s19_s16, [#allocation4]  }
   0x5   :  { %s203_s20 = smov [#allocation6]   ;;  %s204_s22 = smov 128  }
   0x6   :  { %s28_s21 = sshll.u32 %s203_s20, 4  ;;  %s205_s23 = smov 8   ;;  %s29_s21 = int_to_ptr.vmem [resolvable:$true] %s28_s21 }
   0x7   :  { %34 = dma.hbm_to_vmem [thread:$0]  %s27_s19, 2048, %s29_s21, [#allocation7], %s204_s22, %s204_s22, %s205_s23  }
   0x8   :  { %196 = dma.done.wait [#allocation4], 128  }
   0x9   :  { %197 = vsyncadd [#allocation4], 4294967168 }
   0xa   :  { %198 = dma.done.wait [#allocation7], 2048  }
   0xb   :  { %199 = vsyncadd [#allocation7], 4294965248  ;;  %v67_v0 = vld [vmem:[#allocation6 + $0x78] sm:$0xff]  ;;  %v66_v1 = vld [vmem:[#allocation6 + $0x70] sm:$0xff]  ;;  %s206_s24 = smov [#allocation8]   ;;  %s107_s28 = sshll.u32 %s242_s3, 4  ;;  %s108_s28 = int_to_ptr.hbm [resolvable:$true] %s107_s28 }
   0xc   :  { %68 = vmatpush.msra.mxu0 %v67_v0  ;;  %v65_v2 = vld [vmem:[#allocation6 + $0x68] sm:$0xff]  ;;  %v64_v3 = vld [vmem:[#allocation6 + $0x60] sm:$0xff]  ;;  %v63_v4 = vld [vmem:[#allocation6 + $0x58] sm:$0xff]  ;;  %s105_s25 = sshll.u32 %s206_s24, 4  ;;  %s106_s25 = int_to_ptr.vmem [resolvable:$true] %s105_s25 }
   0xd   :  { %v62_v5 = vld [vmem:[#allocation6 + $0x50] sm:$0xff]  ;;  %v61_v6 = vld [vmem:[#allocation6 + $0x48] sm:$0xff]  ;;  %v60_v7 = vld [vmem:[#allocation6 + $0x40] sm:$0xff] }
   0xe   :  { %69 = vmatpush.msra.mxu0 %v66_v1  ;;  %v59_v8 = vld [vmem:[#allocation6 + $0x38] sm:$0xff]  ;;  %v58_v9 = vld [vmem:[#allocation6 + $0x30] sm:$0xff]  ;;  %v57_v10 = vld [vmem:[#allocation6 + $0x28] sm:$0xff] }
   0xf   :  { %v56_v11 = vld [vmem:[#allocation6 + $0x20] sm:$0xff]  ;;  %v55_v12 = vld [vmem:[#allocation6 + $0x18] sm:$0xff]  ;;  %v54_v13 = vld [vmem:[#allocation6 + $0x10] sm:$0xff] }
  0x10   :  { %70 = vmatpush.msra.mxu0 %v65_v2  ;;  %v53_v14 = vld [vmem:[#allocation6 + $0x8] sm:$0xff]  ;;  %v52_v15 = vld [vmem:[#allocation6] sm:$0xff]  ;;  %v51_v16 = vld [vmem:[#allocation3] sm:$0xff] }
  0x11   :  { %v123_v17 = vld [vmem:[%s241_s2] ss:$0 sm:$0xff] }
  0x12   :  { %71 = vmatpush.msra.mxu0 %v64_v3 }
  0x14   :  { %72 = vmatpush.msra.mxu0 %v63_v4 }
  0x16   :  { %73 = vmatpush.msra.mxu0 %v62_v5 }
  0x18   :  { %74 = vmatpush.msra.mxu0 %v61_v6 }
  0x1a   :  { %75 = vmatpush.msra.mxu0 %v60_v7 }
  0x1c   :  { %76 = vmatpush.msra.mxu0 %v59_v8 }
  0x1e   :  { %77 = vmatpush.msra.mxu0 %v58_v9 }
  0x20   :  { %78 = vmatpush.msra.mxu0 %v57_v10 }
  0x22   :  { %79 = vmatpush.msra.mxu0 %v56_v11 }
  0x24   :  { %80 = vmatpush.msra.mxu0 %v55_v12 }
  0x26   :  { %81 = vmatpush.msra.mxu0 %v54_v13 }
  0x28   :  { %82 = vmatpush.msra.mxu0 %v53_v14 }
  0x2a   :  { %83 = vmatpush.msra.mxu0 %v52_v15 }
  0x2b   :  { %84 = vmatmul.f32.vlgmr.msra.gmra.mxu0 %v51_v16 }
  0xa8   :  { %v85_v18 = vpop.f32.mrf.mxu0 }
  0xa9   :  { %v98_v19 = vadd.f32 %v123_v17, %v85_v18 }
  0xab   :  { %99 = vst [vmem:[#allocation8] sm:$0xff] %v98_v19 }
  0xac   :  { %110 = dma.vmem_to_hbm [thread:$0]  %s106_s25, 128, %s108_s28, [#allocation5]  }
  0xad   :  { %200 = dma.done.wait [#allocation5], 128  }
  0xae   :  { %201 = vsyncadd [#allocation5], 4294967168 }
  0xaf   :  { %115 = vsyncpa [#allocation4], 1 }
  0xb0   :  { %116 = vsyncpa [#allocation7], 1 }
  0xb1   :  { %117 = vsyncpa [#allocation5], 1 }

</bundles_post_ra>
